<compile_context>
chip_gen: v5e
topology: v5e:2x2
jax: 0.10.0
libtpu: 0.0.40
codegen_flags: <defaults>
</compile_context>

<pallas_src>
import numpy as np
import jax
import jax.numpy as jnp
from jax.experimental import pallas as pl
from jax.experimental.pallas import tpu as pltpu


# ----------------------------- Pallas kernel --------------------------------

def _expansion_kernel(x_ref, ssel_ref, rsel_ref, out_ref):
    """out[p, f] = Y_{l(f),m(f)}(p) * R_{l(f),n(f)}(p) via two selection matmuls."""
    x = x_ref[...]                                        # [TP, C_in] = sh cols ++ rad cols
    sh_exp = jnp.dot(x, ssel_ref[...], preferred_element_type=jnp.float32)   # [TP, F]
    rad_exp = jnp.dot(x, rsel_ref[...], preferred_element_type=jnp.float32)  # [TP, F]
    out_ref[...] = (sh_exp * rad_exp).astype(out_ref.dtype)


def _selection_matrices(l_max, n_max, dtype):
    """Constant 0/1 matrices mapping merged input columns -> fused (l,m,n) lanes.

    Feature layout (matches torch: l-major, m on axis 1, n on axis 2 after reshape):
        f = base_l + m * n_max + n,   base_l = sum_{l'<l} (2l'+1) * n_max
    Merged input columns: [Y_{0,0} .. Y_{l_max,2l_max}] ++ [R_{0,0} .. R_{l_max,n_max-1}].
    Each selection column has exactly one nonzero (1.0) -> matmul result is bit-exact.
    """
    sh_w = (l_max + 1) ** 2
    c_in = sh_w + (l_max + 1) * n_max
    f_total = (l_max + 1) ** 2 * n_max               # == sum_l (2l+1) * n_max
    s_sel = np.zeros((c_in, f_total), dtype=np.float32)
    r_sel = np.zeros((c_in, f_total), dtype=np.float32)
    f = 0
    for l in range(l_max + 1):
        for m in range(2 * l + 1):
            for n in range(n_max):
                s_sel[l * l + m, f] = 1.0                     # Y_{l,m}
                r_sel[sh_w + l * n_max + n, f] = 1.0          # R_{l,n}
                f += 1
    return jnp.asarray(s_sel, dtype), jnp.asarray(r_sel, dtype)


def vector_expansion_all_l(sh_all, rad_all, *, l_max, n_max, tile_p=2048):
    """Fused vector expansion for all angular channels.

    sh_all  : [P, (l_max+1)^2]      real spherical harmonics, all l concatenated
    rad_all : [P, (l_max+1)*n_max]  radial basis values, all l concatenated
    returns : (out [P, f_total], f_total) with feature layout l-major, m, n-minor.
    """
    assert tile_p % 8 == 0
    p = sh_all.shape[0]
    dtype = sh_all.dtype
    sh_w = (l_max + 1) ** 2
    rad_w = (l_max + 1) * n_max
    assert sh_all.shape[1] == sh_w and rad_all.shape[1] == rad_w
    c_in = sh_w + rad_w
    f_total = (l_max + 1) ** 2 * n_max

    # one merged input array -> one DMA per grid step
    x_all = jnp.concatenate([sh_all, rad_all.astype(dtype)], axis=1)   # [P, c_in]

    # pair-axis padding: only to a multiple of 8 for small structures (no 9x
    # wasted work); to a multiple of tile_p only when the grid is actually used.
    p8 = ((p + 7) // 8) * 8
    if p8 <= tile_p:
        block_p, p_pad = p8, p8
    else:
        block_p = tile_p
        p_pad = ((p + tile_p - 1) // tile_p) * tile_p
    x_all = jnp.pad(x_all, ((0, p_pad - p), (0, 0)))

    s_sel, r_sel = _selection_matrices(l_max, n_max, dtype)            # [c_in, f_total]

    out = pl.pallas_call(
        _expansion_kernel,
        out_shape=jax.ShapeDtypeStruct((p_pad, f_total), dtype),
        grid=(p_pad // block_p,),
        in_specs=[
            pl.BlockSpec((block_p, c_in), lambda i: (i, 0)),
            pl.BlockSpec((c_in, f_total), lambda i: (0, 0)),   # resident across grid
            pl.BlockSpec((c_in, f_total), lambda i: (0, 0)),   # resident across grid
        ],
        out_specs=pl.BlockSpec((block_p, f_total), lambda i: (i, 0)),
        compiler_params=pltpu.CompilerParams(
            dimension_semantics=("parallel",)),   # independent pair tiles
    )(x_all, s_sel, r_sel)
    return out[:p], f_total


# ------------------------------ JAX glue -------------------------------------

def radial_basis(r, n_max, cutoff, l_max):
    # TODO(synk): torch_spex's RadialBasis uses Laplacian-eigenstate splines (and may
    # have a different n_max per l); a deterministic Gaussian basis with a cosine
    # cutoff and a shared n_max is used here instead.
    centers = jnp.linspace(0.0, cutoff, n_max, dtype=jnp.float32)
    sigma = cutoff / n_max
    fc = 0.5 * (jnp.cos(jnp.pi * jnp.clip(r / cutoff, 0.0, 1.0)) + 1.0)
    g = jnp.exp(-0.5 * ((r[:, None] - centers[None, :]) / sigma) ** 2) * fc[:, None]
    return [g for _ in range(l_max + 1)]          # same n_max per l


def spherical_harmonics(vectors, l_max):
    # TODO(synk): verify (l=1) component order / normalization against the
    # torch_spex / e3nn real-SH convention before trusting the (l, m) layout.
    r = jnp.sqrt(jnp.sum(vectors ** 2, axis=-1))
    r_safe = jnp.maximum(r, 1e-12)                # i==j pairs are excluded; guard anyway
    x, y, z = vectors[:, 0] / r_safe, vectors[:, 1] / r_safe, vectors[:, 2] / r_safe
    sh = [jnp.full((vectors.shape[0], 1), 0.5 * np.sqrt(1.0 / np.pi),
                   dtype=vectors.dtype)]
    if l_max >= 1:
        c1 = np.sqrt(3.0 / (4.0 * np.pi))
        sh.append(jnp.stack([c1 * y, c1 * z, c1 * x], axis=-1))
    if l_max >= 2:
        c2 = 0.5 * np.sqrt(15.0 / np.pi)
        c20 = 0.25 * np.sqrt(5.0 / np.pi)
        c22 = 0.25 * np.sqrt(15.0 / np.pi)
        sh.append(jnp.stack([c2 * x * y, c2 * y * z, c20 * (3.0 * z * z - 1.0),
                             c2 * x * z, c22 * (x * x - y * y)], axis=-1))
    return sh


# ------------------------------- driver --------------------------------------

if __name__ == "__main__":
    # small deterministic "structure" (single structure, no PBC)
    key = jax.random.PRNGKey(0)
    kpos, kspec = jax.random.split(key)
    n_atoms = 8
    cutoff = 3.0
    n_max = 4
    l_max = 2
    all_species = np.array([1, 8], dtype=np.int32)
    n_species = len(all_species)

    positions = jax.random.uniform(kpos, (n_atoms, 3), minval=0.0, maxval=3.5,
                                   dtype=jnp.float32)
    species_idx = np.asarray(jax.random.randint(kspec, (n_atoms,), 0, n_species))
    species_numbers = all_species[species_idx]           # atomic numbers per atom

    # neighbor list (no PBC): full i!=j pair list within cutoff
    # TODO(synk): torch_spex uses ase.neighborlist with PBC / cell shifts; plain
    # O(N^2) host-side neighbor search without PBC is used here.
    pos_np = np.asarray(positions)
    centers, neighbors = [], []
    for i in range(n_atoms):
        for j in range(n_atoms):
            if i == j:
                continue
            if np.linalg.norm(pos_np[j] - pos_np[i]) < cutoff:
                centers.append(i)
                neighbors.append(j)
    centers = np.array(centers, dtype=np.int32)
    neighbors = np.array(neighbors, dtype=np.int32)
    P = len(centers)
    assert P > 0, "deterministic toy structure should have neighbor pairs"

    vectors = positions[neighbors] - positions[centers]          # [P, 3]
    r = jnp.sqrt(jnp.sum(vectors ** 2, axis=-1))                 # [P]

    radial = radial_basis(r, n_max, cutoff, l_max)        # list of [P, n_max]
    sh = spherical_harmonics(vectors, l_max)               # list of [P, 2l+1]

    sh_all = jnp.concatenate(sh, axis=1)                   # [P, 9]
    rad_all = jnp.concatenate(radial, axis=1)              # [P, 12]

    # hot path: single fused Pallas call for all l; single host sync
    out_dev, f_total = vector_expansion_all_l(sh_all, rad_all,
                                              l_max=l_max, n_max=n_max,
                                              tile_p=2048)
    out_dev = jax.block_until_ready(out_dev)               # [P, f_total]
    out = np.asarray(out_dev)

    # split into per-l blocks with torch semantics: [P, 2l+1, n_max] (m axis 1, n axis 2)
    expansion_blocks = []
    col = 0
    for l in range(l_max + 1):
        M = 2 * l + 1
        block = out[:, col:col + M * n_max].reshape(P, M, n_max)
        col += M * n_max
        expansion_blocks.append(block)

    # pure-JAX reference for validation (the exact torch expression)
    ok = True
    for l in range(l_max + 1):
        ref = np.asarray(radial[l][:, None, :] * sh[l][:, :, None])   # [P, 2l+1, n_max]
        ok = ok and bool(np.allclose(expansion_blocks[l], ref, atol=1e-5, rtol=1e-5))

    # TensorMap-like container (keys ('l',) -> block values + metadata) — glue only
    samples = np.stack([np.zeros(P, dtype=np.int32), centers, neighbors,
                        species_numbers[centers], species_numbers[neighbors],
                        np.zeros(P, dtype=np.int32), np.zeros(P, dtype=np.int32),
                        np.zeros(P, dtype=np.int32)], axis=-1)
    vector_expansion_tmap = {}
    for l in range(l_max + 1):
        vector_expansion_tmap[(l,)] = {
            "values": expansion_blocks[l],
            "samples": samples,                                   # structure/center/neighbor/...
            "components_m": np.arange(-l, l + 1, dtype=np.int32),
            "properties_n": np.arange(0, n_max, dtype=np.int32),
        }

    if ok:
        print("KERNEL_OK")
    else:
        print("KERNEL_MISMATCH")
</pallas_src>

<mosaic_0001>
module attributes {stable_mosaic.version = 11 : i64} {
  func.func @_expansion_kernel(%arg0: i32, %arg1: memref<40x21xf32, #tpu.memory_space<vmem>>, %arg2: memref<21x36xf32, #tpu.memory_space<vmem>>, %arg3: memref<21x36xf32, #tpu.memory_space<vmem>>, %arg4: memref<40x36xf32, #tpu.memory_space<vmem>>) attributes {dimension_semantics = [#tpu.dimension_semantics<parallel>], iteration_bounds = array<i64: 1>, scalar_prefetch = 0 : i64, scratch_operands = 0 : i64, tpu.core_type = #tpu.core_type<tc>, window_params = [{transform_indices = @transform_0, window_bounds = array<i64: 40, 21>}, {pipeline_mode = #tpu.pipeline_mode<synchronous>, transform_indices = @transform_1, window_bounds = array<i64: 21, 36>}, {pipeline_mode = #tpu.pipeline_mode<synchronous>, transform_indices = @transform_2, window_bounds = array<i64: 21, 36>}, {transform_indices = @transform_3, window_bounds = array<i64: 40, 36>}]} {
    %c0 = arith.constant 0 : index
    %c0_0 = arith.constant 0 : index
    %0 = vector.load %arg1[%c0, %c0_0] : memref<40x21xf32, #tpu.memory_space<vmem>>, vector<40x21xf32>
    %c0_1 = arith.constant 0 : index
    %c0_2 = arith.constant 0 : index
    %1 = vector.load %arg2[%c0_1, %c0_2] : memref<21x36xf32, #tpu.memory_space<vmem>>, vector<21x36xf32>
    %cst = arith.constant dense<0.000000e+00> : vector<40x36xf32>
    %2 = tpu.matmul %0, %1, %cst {dimension_numbers = #tpu.dot_dimension_numbers<[1], [0], [0], [1], [0, 0, 1, 1], [], []>} : vector<40x21xf32>, vector<21x36xf32>, vector<40x36xf32> -> vector<40x36xf32>
    %c0_3 = arith.constant 0 : index
    %c0_4 = arith.constant 0 : index
    %3 = vector.load %arg3[%c0_3, %c0_4] : memref<21x36xf32, #tpu.memory_space<vmem>>, vector<21x36xf32>
    %cst_5 = arith.constant dense<0.000000e+00> : vector<40x36xf32>
    %4 = tpu.matmul %0, %3, %cst_5 {dimension_numbers = #tpu.dot_dimension_numbers<[1], [0], [0], [1], [0, 0, 1, 1], [], []>} : vector<40x21xf32>, vector<21x36xf32>, vector<40x36xf32> -> vector<40x36xf32>
    %5 = arith.mulf %2, %4 : vector<40x36xf32>
    %c0_6 = arith.constant 0 : index
    %c0_7 = arith.constant 0 : index
    %6 = vector.load %arg4[%c0_6, %c0_7] : memref<40x36xf32, #tpu.memory_space<vmem>>, vector<40x36xf32>
    tpu.vector_store %arg4[%c0_6, %c0_7], %5 {strides = array<i32>} : memref<40x36xf32, #tpu.memory_space<vmem>>, vector<40x36xf32>,
    return
  }
  func.func @transform_0(%arg0: i32) -> (i32, i32) {
    %c0_i32 = arith.constant 0 : i32
    %c0_i32_0 = arith.constant 0 : i32
    return %arg0, %c0_i32 : i32, i32
  }
  func.func @transform_1(%arg0: i32) -> (i32, i32) {
    %c0_i32 = arith.constant 0 : i32
    %c0_i32_0 = arith.constant 0 : i32
    %c0_i32_1 = arith.constant 0 : i32
    return %c0_i32, %c0_i32_0 : i32, i32
  }
  func.func @transform_2(%arg0: i32) -> (i32, i32) {
    %c0_i32 = arith.constant 0 : i32
    %c0_i32_0 = arith.constant 0 : i32
    %c0_i32_1 = arith.constant 0 : i32
    return %c0_i32, %c0_i32_0 : i32, i32
  }
  func.func @transform_3(%arg0: i32) -> (i32, i32) {
    %c0_i32 = arith.constant 0 : i32
    %c0_i32_0 = arith.constant 0 : i32
    return %arg0, %c0_i32 : i32, i32
  }
}

</mosaic_0001>

<bundles_post_ra>
// kernel: tpu_custom_call.1
= control target key start
LH: loop header
LB: loop body
LE: loop exit
PB: predicated region body
PF: predicated region fallthrough
CT: control target
= control target key end

     0   :  { %vm39_vm0 = vcmask 1044480   ;;  %vm23_vm1 = vcmask 171008   ;;  %s263_s0 = inlined_call_operand.vmem [shape: f32[40,21], index: 0, kind: input, shape index: {}]   ;;  %s264_s1 = inlined_call_operand.vmem [shape: f32[21,36], index: 1, kind: input, shape index: {}]   ;;  %s265_s2 = inlined_call_operand.vmem [shape: f32[21,36], index: 2, kind: input, shape index: {}]   ;;  %s266_s3 = inlined_call_operand.hbm [shape: f32[40,36], index: 3, kind: output, shape index: {}]  }
   0x1   :  { %v22_v0 = vld [vmem:[%s264_s1 + $0x10] sm:$0x1f]  ;;  %v21_v2 = vld [vmem:[%s264_s1 + $0x8] sm:$0xff]  ;;  %v20_v4 = vld [vmem:[%s264_s1] sm:$0xff] }
   0x2   :  { %v77_v1 = vld [vmem:[%s265_s2 + $0x10] sm:$0x1f]  ;;  %142 = vmatpush.msk.msra.mxu0 %vm39_vm0, %v22_v0  ;;  %v76_v3 = vld [vmem:[%s265_s2 + $0x8] sm:$0xff]  ;;  %154 = vmatpush.msk.msra.mxu2 %vm39_vm0, %v22_v0  ;;  %v75_v5 = vld [vmem:[%s265_s2] sm:$0xff] }
   0x3   :  { %148 = vmatpush.msk.msra.mxu1 %vm39_vm0, %v77_v1  ;;  %157 = vmatpush.msk.msra.mxu3 %vm39_vm0, %v77_v1  ;;  %v15_v6 = vld [vmem:[%s263_s0] sm:$0xff] }
   0x4   :  { %57 = vmatpush.msra.mxu0 %v21_v2 }
   0x5   :  { %95 = vmatpush.msra.mxu1 %v76_v3 }
   0x6   :  { %8 = vsyncpa [#allocation3], 0  ;;  %155 = vmatpush.msra.mxu2 %v21_v2  ;;  %158 = vmatpush.msra.mxu3 %v76_v3  ;;  %v18_v7 = vld [vmem:[%s263_s0 + $0x18] sm:$0xff]  ;;  %v16_v8 = vld [vmem:[%s263_s0 + $0x8] sm:$0xff]  ;;  %vm118_vm2 = vcmask 293888   ;;  %s130_s8 = sshll.u32 %s266_s3, 4  ;;  %s131_s8 = int_to_ptr.hbm [resolvable:$true] %s130_s8 }
   0x7   :  { %58 = vmatpush.msra.mxu0 %v20_v4  ;;  %96 = vmatpush.msra.mxu1 %v75_v5  ;;  %v19_v9 = vld [vmem:[%s263_s0 + $0x20] sm:$0xff]  ;;  %v17_v10 = vld [vmem:[%s263_s0 + $0x10] sm:$0xff]  ;;  %s189_s0 = smov [#allocation2]   ;;  %s190_s9 = smov 128  }
   0x8   :  { %143 = vmatmul.msk.f32.vlgmr.msra.gmra.mxu0 %vm23_vm1, %v15_v6  ;;  %149 = vmatmul.msk.f32.vlgmr.msra.gmra.mxu1 %vm23_vm1, %v15_v6  ;;  %s128_s5 = sshll.u32 %s189_s0, 4  ;;  %s191_s10 = smov 8   ;;  %s129_s5 = int_to_ptr.vmem [resolvable:$true] %s128_s5 }
   0x9   :  { %156 = vmatpush.msra.mxu2 %v20_v4  ;;  %159 = vmatpush.msra.mxu3 %v75_v5 }
   0xa   :  { %146 = vmatmul.msk.f32.vlgmr.msra.gmra.mxu2 %vm23_vm1, %v18_v7  ;;  %152 = vmatmul.msk.f32.vlgmr.msra.gmra.mxu3 %vm23_vm1, %v18_v7 }
  0x10   :  { %144 = vmatmul.msk.f32.gmra.mxu0 %vm23_vm1, %v16_v8  ;;  %150 = vmatmul.msk.f32.gmra.mxu1 %vm23_vm1, %v16_v8 }
  0x12   :  { %147 = vmatmul.msk.f32.gmra.mxu2 %vm23_vm1, %v19_v9  ;;  %153 = vmatmul.msk.f32.gmra.mxu3 %vm23_vm1, %v19_v9 }
  0x18   :  { %145 = vmatmul.msk.f32.gmra.mxu0 %vm23_vm1, %v17_v10  ;;  %151 = vmatmul.msk.f32.gmra.mxu1 %vm23_vm1, %v17_v10 }
  0x85   :  { %v60_v11 = vpop.f32.mrf.mxu0  ;;  %v98_v12 = vpop.f32.mrf.mxu1 }
  0x86   :  { %v113_v13 = vmul.f32 %v98_v12, %v60_v11 }
  0x88   :  { %119 = vst.msk [vmem:[#allocation2] sm:$0xff] %vm118_vm2, %v113_v13 }
  0x8d   :  { %v63_v14 = vpop.f32.mrf.mxu0  ;;  %v69_v15 = vpop.f32.mrf.mxu2 }
  0x8e   :  { %v101_v16 = vpop.f32.mrf.mxu1  ;;  %v107_v17 = vpop.f32.mrf.mxu3 }
  0x8f   :  { %v114_v18 = vmul.f32 %v101_v16, %v63_v14  ;;  %v116_v19 = vmul.f32 %v107_v17, %v69_v15 }
  0x91   :  { %120 = vst.msk [vmem:[#allocation2 + $0x8] sm:$0xff] %vm118_vm2, %v114_v18 }
  0x92   :  { %122 = vst.msk [vmem:[#allocation2 + $0x18] sm:$0xff] %vm118_vm2, %v116_v19 }
  0x95   :  { %v66_v20 = vpop.f32.mrf.mxu0  ;;  %v72_v21 = vpop.f32.mrf.mxu2 }
  0x96   :  { %v104_v22 = vpop.f32.mrf.mxu1  ;;  %v110_v23 = vpop.f32.mrf.mxu3 }
  0x97   :  { %v115_v24 = vmul.f32 %v104_v22, %v66_v20  ;;  %v117_v25 = vmul.f32 %v110_v23, %v72_v21 }
  0x99   :  { %121 = vst.msk [vmem:[#allocation2 + $0x10] sm:$0xff] %vm118_vm2, %v115_v24 }
  0x9a   :  { %123 = vst.msk [vmem:[#allocation2 + $0x20] sm:$0xff] %vm118_vm2, %v117_v25 }
  0x9b   :  { %136 = dma.vmem_to_hbm [thread:$0]  %s129_s5, 640, %s131_s8, [#allocation3], %s190_s9, %s190_s9, %s191_s10  }
  0x9c   :  { %187 = dma.done.wait [#allocation3], 640  }
  0x9d   :  { %188 = vsyncadd [#allocation3], 4294966656 }
  0x9e   :  { %141 = vsyncpa [#allocation3], 1 }

</bundles_post_ra>
